<compile_context>
chip_gen: v5e
topology: v5e:2x2
jax: 0.10.0
libtpu: 0.0.40
codegen_flags: <defaults>
</compile_context>

<pallas_src>
import jax
import jax.numpy as jnp
from jax.experimental import pallas as pl
from jax.experimental.pallas import tpu as pltpu

_LANE = 128  # TPU lane width.


def _mlp_kernel(x_ref, w1_ref, b1_ref, w2_ref, b2_ref, w3_ref, b3_ref, o_ref):
    """Fused (bm,99)@(99,128) -> ReLU -> @(128,128) -> ReLU -> @(128,Cp)."""
    # Single f32 HBM read of the activations; cast to the MXU operand dtype
    # in VMEM (no wrapper pre-pass).  K stays 99 — Mosaic masks the lane pad.
    x = x_ref[...].astype(w1_ref.dtype)

    h1 = jnp.dot(x, w1_ref[...], preferred_element_type=jnp.float32)
    h1 = jnp.maximum(h1 + b1_ref[...], 0.0)  # f32 epilogue on the VPU

    h2 = jnp.dot(h1.astype(w2_ref.dtype), w2_ref[...],
                 preferred_element_type=jnp.float32)
    h2 = jnp.maximum(h2 + b2_ref[...], 0.0)

    out = jnp.dot(h2.astype(w3_ref.dtype), w3_ref[...],
                  preferred_element_type=jnp.float32) + b3_ref[...]
    o_ref[...] = out.astype(o_ref.dtype)


def _round_up(v, m):
    return (v + m - 1) // m * m


def _pad2d(a, rows, cols):
    return jnp.pad(a, ((0, rows - a.shape[0]), (0, cols - a.shape[1])))


def _num_tensorcores():
    """Best-effort TensorCores-per-chip (v7x megacore = 2); defaults to 1."""
    try:
        info = pltpu.get_tpu_info()
    except Exception:
        return 1
    for attr in ("num_cores", "cores_per_chip", "core_count", "num_tensorcores"):
        v = getattr(info, attr, None)
        if isinstance(v, int) and v > 0:
            return v
    return 1


def pose_mlp_forward(x, params, *, block_m=2048, compute_dtype=jnp.bfloat16,
                     out_dtype=None):
    """Run the PoseCNN forward pass.

    Args:
      x: (N, 99) float32 input (consumed raw; cast happens in-kernel).
      params: dict with PyTorch-convention weights:
        w1 (128, 99), b1 (128,), w2 (64, 128), b2 (64,), w3 (C, 64), b3 (C,)
      block_m: requested batch tile (multiple of 8, clamped to batch, <= 8192).
      compute_dtype: MXU operand dtype (bf16 default; accumulation always f32).
      out_dtype: HBM writeback dtype (defaults to compute_dtype => bf16 halves
        the largest HBM stream).
    Returns:
      (N, C) logits in out_dtype.
    """
    n, d_in = x.shape
    assert d_in == 99
    num_classes = params["w3"].shape[0]
    n_out = _round_up(num_classes, _LANE)  # lane-dense padded class dim
    if out_dtype is None:
        out_dtype = compute_dtype

    # ---- pick the batch tile --------------------------------------------
    cores = _num_tensorcores()
    block_m = int(block_m)
    block_m = max(8, min((block_m // 8) * 8, 8192))
    block_m = min(block_m, _round_up(n, 8))
    if cores >= 2 and n > 8:
        # Multi-TC (v7x megacore): keep the step count a multiple of the core
        # count so the "parallel" axis load-balances across TensorCores.
        steps = pl.cdiv(n, block_m)
        steps = _round_up(steps, cores) if steps > 1 else cores
        block_m = max(8, _round_up(pl.cdiv(n, steps), 8))
    grid_m = pl.cdiv(n, block_m)  # ragged last tile; no batch padding

    # ---- pack weights (tiny; zero-padding is exact) ----------------------
    w1 = params["w1"].T.astype(compute_dtype)                       # (99, 128)
    w2 = _pad2d(params["w2"].T, _LANE, _LANE).astype(compute_dtype)  # (128,128)
    w3 = _pad2d(params["w3"].T, _LANE, n_out).astype(compute_dtype)  # (128,Cp)
    b1 = params["b1"][None, :].astype(jnp.float32)                   # (1, 128)
    b2 = _pad2d(params["b2"][None, :].astype(jnp.float32), 1, _LANE)
    b3 = _pad2d(params["b3"][None, :].astype(jnp.float32), 1, n_out)

    # Weights/biases stay VMEM-resident (not streamed through the pipeline).
    resident = pl.BlockSpec(memory_space=pltpu.MemorySpace.VMEM)

    # Scoped-VMEM estimate (double-buffered x/out + f32 intermediates +
    # resident weights) so big tiles survive v5e's 16 MiB scoped default.
    o_isz = jnp.dtype(out_dtype).itemsize
    c_isz = jnp.dtype(compute_dtype).itemsize
    est = (2 * block_m * _LANE * 4                    # x (f32, lane-padded), 2 bufs
           + 2 * block_m * n_out * o_isz              # out, 2 bufs
           + 4 * block_m * _LANE * 4                  # f32 h1/h2/out temps (generous)
           + (99 * _LANE + _LANE * _LANE + _LANE * n_out) * c_isz  # weights
           + 4 * max(_LANE, n_out) * 4)               # biases
    vmem_limit = min(max(est + (8 << 20), 32 << 20), 56 << 20)

    out = pl.pallas_call(
        _mlp_kernel,
        out_shape=jax.ShapeDtypeStruct((n, n_out), out_dtype),
        grid_spec=pl.GridSpec(
            grid=(grid_m,),
            in_specs=[
                pl.BlockSpec((block_m, d_in), lambda i: (i, 0)),  # raw x tile
                resident,  # w1
                resident,  # b1
                resident,  # w2
                resident,  # b2
                resident,  # w3
                resident,  # b3
            ],
            out_specs=pl.BlockSpec((block_m, n_out), lambda i: (i, 0)),
        ),
        compiler_params=pltpu.CompilerParams(
            dimension_semantics=("parallel",),
            vmem_limit_bytes=int(vmem_limit),
        ),
    )(x, w1, b1, w2, b2, w3, b3)

    # TODO(synk): downstream consumers that can take the padded (N, n_out)
    # block should skip this slice (it re-reads the output once).
    return out[:, :num_classes]


def init_params(key, num_classes):
    """Deterministic synthetic parameters with PyTorch nn.Linear shapes."""
    ks = jax.random.split(key, 6)

    def linear_init(kw, kb, out_f, in_f):
        bound = 1.0 / jnp.sqrt(jnp.float32(in_f))
        w = jax.random.uniform(kw, (out_f, in_f), jnp.float32, -bound, bound)
        b = jax.random.uniform(kb, (out_f,), jnp.float32, -bound, bound)
        return w, b

    w1, b1 = linear_init(ks[0], ks[1], 128, 99)
    w2, b2 = linear_init(ks[2], ks[3], 64, 128)
    w3, b3 = linear_init(ks[4], ks[5], num_classes, 64)
    return {"w1": w1, "b1": b1, "w2": w2, "b2": b2, "w3": w3, "b3": b3}


def reference_forward(x, p):
    h1 = jnp.maximum(x @ p["w1"].T + p["b1"], 0.0)
    h2 = jnp.maximum(h1 @ p["w2"].T + p["b2"], 0.0)
    return h2 @ p["w3"].T + p["b3"]


if __name__ == "__main__":
    key = jax.random.PRNGKey(0)
    k_params, k_x = jax.random.split(key)

    num_classes = 10
    batch = 16

    params = init_params(k_params, num_classes)
    x = jax.random.normal(k_x, (batch, 99), dtype=jnp.float32)

    ref = reference_forward(x, params)

    # Exact f32 path (tight check against the reference).
    out_f32 = pose_mlp_forward(x, params, compute_dtype=jnp.float32)
    out_f32 = jax.block_until_ready(out_f32)
    assert out_f32.shape == (batch, num_classes)
    assert jnp.allclose(out_f32, ref, atol=1e-4, rtol=1e-4), "f32 mismatch"

    # Default fast path: bf16 MXU operands + bf16 writeback, f32 accumulation.
    out_bf16 = pose_mlp_forward(x, params)
    out_bf16 = jax.block_until_ready(out_bf16)
    assert out_bf16.shape == (batch, num_classes)
    assert jnp.allclose(out_bf16.astype(jnp.float32), ref,
                        atol=5e-2, rtol=5e-2), "bf16 mismatch"

    # Also exercise a ragged batch (not a multiple of the tile / of 8).
    x_rag = jax.random.normal(k_x, (37, 99), dtype=jnp.float32)
    out_rag = jax.block_until_ready(
        pose_mlp_forward(x_rag, params, block_m=16, compute_dtype=jnp.float32))
    assert out_rag.shape == (37, num_classes)
    assert jnp.allclose(out_rag, reference_forward(x_rag, params),
                        atol=1e-4, rtol=1e-4), "ragged mismatch"

    print("KERNEL_OK")
</pallas_src>

<mosaic_0001>
module attributes {stable_mosaic.version = 11 : i64} {
  func.func @_mlp_kernel(%arg0: i32, %arg1: memref<16x99xf32, #tpu.memory_space<vmem>>, %arg2: memref<99x128xf32, #tpu.memory_space<vmem>>, %arg3: memref<1x128xf32, #tpu.memory_space<vmem>>, %arg4: memref<128x128xf32, #tpu.memory_space<vmem>>, %arg5: memref<1x128xf32, #tpu.memory_space<vmem>>, %arg6: memref<128x128xf32, #tpu.memory_space<vmem>>, %arg7: memref<1x128xf32, #tpu.memory_space<vmem>>, %arg8: memref<16x128xf32, #tpu.memory_space<vmem>>) attributes {dimension_semantics = [#tpu.dimension_semantics<parallel>], iteration_bounds = array<i64: 1>, scalar_prefetch = 0 : i64, scratch_operands = 0 : i64, tpu.core_type = #tpu.core_type<tc>, window_params = [{transform_indices = @transform_0, window_bounds = array<i64: 16, 99>}, {pipeline_mode = #tpu.pipeline_mode<synchronous>, transform_indices = @transform_1, window_bounds = array<i64: 99, 128>}, {pipeline_mode = #tpu.pipeline_mode<synchronous>, transform_indices = @transform_2, window_bounds = array<i64: 1, 128>}, {pipeline_mode = #tpu.pipeline_mode<synchronous>, transform_indices = @transform_3, window_bounds = array<i64: 128, 128>}, {pipeline_mode = #tpu.pipeline_mode<synchronous>, transform_indices = @transform_4, window_bounds = array<i64: 1, 128>}, {pipeline_mode = #tpu.pipeline_mode<synchronous>, transform_indices = @transform_5, window_bounds = array<i64: 128, 128>}, {pipeline_mode = #tpu.pipeline_mode<synchronous>, transform_indices = @transform_6, window_bounds = array<i64: 1, 128>}, {transform_indices = @transform_7, window_bounds = array<i64: 16, 128>}]} {
    %c0 = arith.constant 0 : index
    %c0_0 = arith.constant 0 : index
    %0 = vector.load %arg1[%c0, %c0_0] : memref<16x99xf32, #tpu.memory_space<vmem>>, vector<16x99xf32>
    %c0_1 = arith.constant 0 : index
    %c0_2 = arith.constant 0 : index
    %1 = vector.load %arg2[%c0_1, %c0_2] : memref<99x128xf32, #tpu.memory_space<vmem>>, vector<99x128xf32>
    %cst = arith.constant dense<0.000000e+00> : vector<16x128xf32>
    %2 = tpu.matmul %0, %1, %cst {dimension_numbers = #tpu.dot_dimension_numbers<[1], [0], [0], [1], [0, 0, 1, 1], [], []>} : vector<16x99xf32>, vector<99x128xf32>, vector<16x128xf32> -> vector<16x128xf32>
    %c0_3 = arith.constant 0 : index
    %c0_4 = arith.constant 0 : index
    %3 = vector.load %arg3[%c0_3, %c0_4] : memref<1x128xf32, #tpu.memory_space<vmem>>, vector<1x128xf32>
    %4 = vector.broadcast %3 : vector<1x128xf32> to vector<16x128xf32>
    %5 = arith.addf %2, %4 : vector<16x128xf32>
    %cst_5 = arith.constant 0.000000e+00 : f32
    %6 = vector.broadcast %cst_5 : f32 to vector<16x128xf32>
    %7 = arith.maximumf %5, %6 : vector<16x128xf32>
    %c0_6 = arith.constant 0 : index
    %c0_7 = arith.constant 0 : index
    %8 = vector.load %arg4[%c0_6, %c0_7] : memref<128x128xf32, #tpu.memory_space<vmem>>, vector<128x128xf32>
    %cst_8 = arith.constant dense<0.000000e+00> : vector<16x128xf32>
    %9 = tpu.matmul %7, %8, %cst_8 {dimension_numbers = #tpu.dot_dimension_numbers<[1], [0], [0], [1], [0, 0, 1, 1], [], []>} : vector<16x128xf32>, vector<128x128xf32>, vector<16x128xf32> -> vector<16x128xf32>
    %c0_9 = arith.constant 0 : index
    %c0_10 = arith.constant 0 : index
    %10 = vector.load %arg5[%c0_9, %c0_10] : memref<1x128xf32, #tpu.memory_space<vmem>>, vector<1x128xf32>
    %11 = vector.broadcast %10 : vector<1x128xf32> to vector<16x128xf32>
    %12 = arith.addf %9, %11 : vector<16x128xf32>
    %cst_11 = arith.constant 0.000000e+00 : f32
    %13 = vector.broadcast %cst_11 : f32 to vector<16x128xf32>
    %14 = arith.maximumf %12, %13 : vector<16x128xf32>
    %c0_12 = arith.constant 0 : index
    %c0_13 = arith.constant 0 : index
    %15 = vector.load %arg6[%c0_12, %c0_13] : memref<128x128xf32, #tpu.memory_space<vmem>>, vector<128x128xf32>
    %cst_14 = arith.constant dense<0.000000e+00> : vector<16x128xf32>
    %16 = tpu.matmul %14, %15, %cst_14 {dimension_numbers = #tpu.dot_dimension_numbers<[1], [0], [0], [1], [0, 0, 1, 1], [], []>} : vector<16x128xf32>, vector<128x128xf32>, vector<16x128xf32> -> vector<16x128xf32>
    %c0_15 = arith.constant 0 : index
    %c0_16 = arith.constant 0 : index
    %17 = vector.load %arg7[%c0_15, %c0_16] : memref<1x128xf32, #tpu.memory_space<vmem>>, vector<1x128xf32>
    %18 = vector.broadcast %17 : vector<1x128xf32> to vector<16x128xf32>
    %19 = arith.addf %16, %18 : vector<16x128xf32>
    %c0_17 = arith.constant 0 : index
    %c0_18 = arith.constant 0 : index
    %20 = vector.load %arg8[%c0_17, %c0_18] : memref<16x128xf32, #tpu.memory_space<vmem>>, vector<16x128xf32>
    tpu.vector_store %arg8[%c0_17, %c0_18], %19 {strides = array<i32>} : memref<16x128xf32, #tpu.memory_space<vmem>>, vector<16x128xf32>,
    return
  }
  func.func @transform_0(%arg0: i32) -> (i32, i32) {
    %c0_i32 = arith.constant 0 : i32
    %c0_i32_0 = arith.constant 0 : i32
    return %arg0, %c0_i32 : i32, i32
  }
  func.func @transform_1(%arg0: i32) -> (i32, i32) {
    %c0_i32 = arith.constant 0 : i32
    %c0_i32_0 = arith.constant 0 : i32
    %c0_i32_1 = arith.constant 0 : i32
    return %c0_i32, %c0_i32_0 : i32, i32
  }
  func.func @transform_2(%arg0: i32) -> (i32, i32) {
    %c0_i32 = arith.constant 0 : i32
    %c0_i32_0 = arith.constant 0 : i32
    %c0_i32_1 = arith.constant 0 : i32
    return %c0_i32, %c0_i32_0 : i32, i32
  }
  func.func @transform_3(%arg0: i32) -> (i32, i32) {
    %c0_i32 = arith.constant 0 : i32
    %c0_i32_0 = arith.constant 0 : i32
    %c0_i32_1 = arith.constant 0 : i32
    return %c0_i32, %c0_i32_0 : i32, i32
  }
  func.func @transform_4(%arg0: i32) -> (i32, i32) {
    %c0_i32 = arith.constant 0 : i32
    %c0_i32_0 = arith.constant 0 : i32
    %c0_i32_1 = arith.constant 0 : i32
    return %c0_i32, %c0_i32_0 : i32, i32
  }
  func.func @transform_5(%arg0: i32) -> (i32, i32) {
    %c0_i32 = arith.constant 0 : i32
    %c0_i32_0 = arith.constant 0 : i32
    %c0_i32_1 = arith.constant 0 : i32
    return %c0_i32, %c0_i32_0 : i32, i32
  }
  func.func @transform_6(%arg0: i32) -> (i32, i32) {
    %c0_i32 = arith.constant 0 : i32
    %c0_i32_0 = arith.constant 0 : i32
    %c0_i32_1 = arith.constant 0 : i32
    return %c0_i32, %c0_i32_0 : i32, i32
  }
  func.func @transform_7(%arg0: i32) -> (i32, i32) {
    %c0_i32 = arith.constant 0 : i32
    %c0_i32_0 = arith.constant 0 : i32
    return %arg0, %c0_i32 : i32, i32
  }
}

</mosaic_0001>

<bundles_post_ra>
// kernel: tpu_custom_call.1
= control target key start
LH: loop header
LB: loop body
LE: loop exit
PB: predicated region body
PF: predicated region fallthrough
CT: control target
= control target key end

     0   :  { %12 = vsyncpa [#allocation3], 0  ;;  %s499_s0 = inlined_call_operand.hbm [shape: f32[16,99], index: 0, kind: input, shape index: {}]   ;;  %s500_s1 = inlined_call_operand.hbm [shape: f32[99,128], index: 1, kind: input, shape index: {}]   ;;  %s501_s2 = inlined_call_operand.vmem [shape: f32[1,128], index: 2, kind: input, shape index: {}]   ;;  %s502_s3 = inlined_call_operand.hbm [shape: f32[128,128], index: 3, kind: input, shape index: {}]   ;;  %s503_s4 = inlined_call_operand.vmem [shape: f32[1,128], index: 4, kind: input, shape index: {}]   ;;  %s504_s5 = inlined_call_operand.hbm [shape: f32[128,128], index: 5, kind: input, shape index: {}]   ;;  %s505_s6 = inlined_call_operand.vmem [shape: f32[1,128], index: 6, kind: input, shape index: {}]   ;;  %s506_s7 = inlined_call_operand.hbm [shape: f32[16,128], index: 7, kind: output, shape index: {}]  }
   0x1   :  { %13 = vsyncpa [#allocation6], 0 }
   0x2   :  { %14 = vsyncpa [#allocation9], 0 }
   0x3   :  { %15 = vsyncpa [#allocation4], 0  ;;  %s33_s26 = sshll.u32 %s500_s1, 4  ;;  %s413_s27 = smov [#allocation5]   ;;  %s34_s26 = int_to_ptr.hbm [resolvable:$true] %s33_s26 }
   0x4   :  { %s35_s28 = sshll.u32 %s413_s27, 4  ;;  %s20_s8 = sshll.u32 %s499_s0, 4  ;;  %s36_s28 = int_to_ptr.vmem [resolvable:$true] %s35_s28  ;;  %s21_s8 = int_to_ptr.hbm [resolvable:$true] %s20_s8 }
   0x5   :  { %s414_s9 = smov 128   ;;  %s415_s10 = smov 8  }
   0x6   :  { %41 = dma.hbm_to_vmem [thread:$0]  %s34_s26, 1664, %s36_s28, [#allocation6], %s414_s9, %s414_s9, %s415_s10  }
   0x7   :  { %s416_s11 = smov [#allocation2]   ;;  %s48_s1 = sshll.u32 %s502_s3, 4  ;;  %s49_s1 = int_to_ptr.hbm [resolvable:$true] %s48_s1 }
   0x8   :  { %s22_s12 = sshll.u32 %s416_s11, 4  ;;  %s63_s16 = sshll.u32 %s504_s5, 4  ;;  %s23_s12 = int_to_ptr.vmem [resolvable:$true] %s22_s12  ;;  %s64_s16 = int_to_ptr.hbm [resolvable:$true] %s63_s16 }
   0x9   :  { %28 = dma.hbm_to_vmem [thread:$0]  %s21_s8, 256, %s23_s12, [#allocation3], %s414_s9, %s414_s9, %s415_s10  }
   0xa   :  { %s417_s17 = smov [#allocation7]   ;;  %s418_s19 = smov [#allocation8]  }
   0xb   :  { %s50_s18 = sshll.u32 %s417_s17, 4  ;;  %s65_s3 = sshll.u32 %s418_s19, 4  ;;  %s51_s18 = int_to_ptr.vmem [resolvable:$true] %s50_s18  ;;  %s66_s3 = int_to_ptr.vmem [resolvable:$true] %s65_s3 }
   0xc   :  { %56 = dma.hbm_to_vmem [thread:$0]  %s49_s1, 2048, %s51_s18, [#allocation6], %s414_s9, %s414_s9, %s415_s10  }
   0xd   :  { %71 = dma.hbm_to_vmem [thread:$0]  %s64_s16, 2048, %s66_s3, [#allocation9], %s414_s9, %s414_s9, %s415_s10  }
   0xe   :  { %405 = dma.done.wait [#allocation3], 256  }
   0xf   :  { %406 = vsyncadd [#allocation3], 4294967040 }
  0x10   :  { %407 = dma.done.wait [#allocation6], 3712  }
  0x11   :  { %408 = vsyncadd [#allocation6], 4294963584 }
  0x12   :  { %409 = dma.done.wait [#allocation9], 2048  }
  0x13   :  { %410 = vsyncadd [#allocation9], 4294965248  ;;  %vm116_vm0 = vcmask 1042432   ;;  %v104_v0 = vld [vmem:[#allocation5 + $0x60] sm:$0x7]  ;;  %v103_v1 = vld [vmem:[#allocation5 + $0x58] sm:$0xff] }
  0x14   :  { %256 = vmatpush.msk.msra.mxu0 %vm116_vm0, %v104_v0  ;;  %v102_v2 = vld [vmem:[#allocation5 + $0x50] sm:$0xff]  ;;  %v101_v3 = vld [vmem:[#allocation5 + $0x48] sm:$0xff]  ;;  %v160_v4 = vld [vmem:[#allocation7 + $0x78] sm:$0xff]  ;;  %vm109_vm1 = vcmask 809984   ;;  %s419_s24 = smov [#allocation10]  }
  0x15   :  { %v159_v5 = vld [vmem:[#allocation7 + $0x70] sm:$0xff]  ;;  %v100_v6 = vld [vmem:[#allocation5 + $0x40] sm:$0xff]  ;;  %165 = vmatpush.msra.mxu1 %v160_v4  ;;  %259 = vmatpush.msra.mxu3 %v160_v4  ;;  %v158_v7 = vld [vmem:[#allocation7 + $0x68] sm:$0xff]  ;;  %s239_s25 = sshll.u32 %s419_s24, 4  ;;  %s240_s25 = int_to_ptr.vmem [resolvable:$true] %s239_s25 }
  0x16   :  { %124 = vmatpush.msra.mxu0 %v103_v1  ;;  %v99_v8 = vld [vmem:[#allocation5 + $0x38] sm:$0xff]  ;;  %v157_v9 = vld [vmem:[#allocation7 + $0x60] sm:$0xff]  ;;  %v98_v10 = vld [vmem:[#allocation5 + $0x30] sm:$0xff] }
  0x17   :  { %166 = vmatpush.msra.mxu1 %v159_v5  ;;  %260 = vmatpush.msra.mxu3 %v159_v5  ;;  %v156_v11 = vld [vmem:[#allocation7 + $0x58] sm:$0xff]  ;;  %v97_v12 = vld [vmem:[#allocation5 + $0x28] sm:$0xff]  ;;  %v155_v13 = vld [vmem:[#allocation7 + $0x50] sm:$0xff] }
  0x18   :  { %125 = vmatpush.msra.mxu0 %v102_v2  ;;  %v96_v14 = vld [vmem:[#allocation5 + $0x20] sm:$0xff]  ;;  %v154_v15 = vld [vmem:[#allocation7 + $0x48] sm:$0xff]  ;;  %v95_v16 = vld [vmem:[#allocation5 + $0x18] sm:$0xff] }
  0x19   :  { %167 = vmatpush.msra.mxu1 %v158_v7  ;;  %261 = vmatpush.msra.mxu3 %v158_v7  ;;  %v153_v17 = vld [vmem:[#allocation7 + $0x40] sm:$0xff]  ;;  %v94_v18 = vld [vmem:[#allocation5 + $0x10] sm:$0xff]  ;;  %v152_v19 = vld [vmem:[#allocation7 + $0x38] sm:$0xff] }
  0x1a   :  { %126 = vmatpush.msra.mxu0 %v101_v3  ;;  %v93_v20 = vld [vmem:[#allocation5 + $0x8] sm:$0xff]  ;;  %v151_v21 = vld [vmem:[#allocation7 + $0x30] sm:$0xff]  ;;  %v92_v22 = vld [vmem:[#allocation5] sm:$0xff] }
  0x1b   :  { %168 = vmatpush.msra.mxu1 %v157_v9  ;;  %262 = vmatpush.msra.mxu3 %v157_v9  ;;  %v90_v23 = vld [vmem:[#allocation2] sm:$0xff]  ;;  %v149_v25 = vld [vmem:[#allocation7 + $0x20] sm:$0xff]  ;;  %v148_v26 = vld [vmem:[#allocation7 + $0x18] sm:$0xff] }
  0x1c   :  { %127 = vmatpush.msra.mxu0 %v100_v6  ;;  %v150_v24 = vld [vmem:[#allocation7 + $0x28] sm:$0xff]  ;;  %v91_v27 = vld [vmem:[#allocation2 + $0x8] sm:$0xff]  ;;  %v145_v30 = vld [vmem:[#allocation7] sm:$0xff] }
  0x1d   :  { %169 = vmatpush.msra.mxu1 %v156_v11  ;;  %263 = vmatpush.msra.mxu3 %v156_v11  ;;  %v147_v28 = vld [vmem:[#allocation7 + $0x10] sm:$0xff]  ;;  %v146_v29 = vld [vmem:[#allocation7 + $0x8] sm:$0xff]  ;;  %v205_v31 = vld [vmem:[#allocation8 + $0x78] sm:$0xff] }
  0x1e   :  { %128 = vmatpush.msra.mxu0 %v99_v8  ;;  %v204_v32 = vld [vmem:[#allocation8 + $0x70] sm:$0xff]  ;;  %210 = vmatpush.msra.mxu2 %v205_v31  ;;  %v203_v33 = vld [vmem:[#allocation8 + $0x68] sm:$0xff]  ;;  %v202_v34 = vld [vmem:[#allocation8 + $0x60] sm:$0xff] }
  0x1f   :  { %170 = vmatpush.msra.mxu1 %v155_v13  ;;  %264 = vmatpush.msra.mxu3 %v155_v13  ;;  %v201_v35 = vld [vmem:[#allocation8 + $0x58] sm:$0xff]  ;;  %v200_v36 = vld [vmem:[#allocation8 + $0x50] sm:$0xff]  ;;  %v199_v37 = vld [vmem:[#allocation8 + $0x48] sm:$0xff] }
  0x20   :  { %129 = vmatpush.msra.mxu0 %v98_v10  ;;  %211 = vmatpush.msra.mxu2 %v204_v32  ;;  %v198_v38 = vld [vmem:[#allocation8 + $0x40] sm:$0xff]  ;;  %v197_v39 = vld [vmem:[#allocation8 + $0x38] sm:$0xff]  ;;  %v282_v40 = vld [vmem:[%s501_s2] ss:$0 sm:$0xff] }
  0x21   :  { %171 = vmatpush.msra.mxu1 %v154_v15  ;;  %265 = vmatpush.msra.mxu3 %v154_v15  ;;  %v196_v41 = vld [vmem:[#allocation8 + $0x30] sm:$0xff]  ;;  %v195_v42 = vld [vmem:[#allocation8 + $0x28] sm:$0xff]  ;;  %v194_v45 = vld [vmem:[#allocation8 + $0x20] sm:$0xff] }
  0x22   :  { %130 = vmatpush.msra.mxu0 %v97_v12  ;;  %212 = vmatpush.msra.mxu2 %v203_v33  ;;  %v193_v47 = vld [vmem:[#allocation8 + $0x18] sm:$0xff]  ;;  %v192_v51 = vld [vmem:[#allocation8 + $0x10] sm:$0xff]  ;;  %v191_v52 = vld [vmem:[#allocation8 + $0x8] sm:$0xff] }
  0x23   :  { %172 = vmatpush.msra.mxu1 %v153_v17  ;;  %266 = vmatpush.msra.mxu3 %v153_v17  ;;  %v190_v53 = vld [vmem:[#allocation8] sm:$0xff]  ;;  %v283_v54 = vld [vmem:[%s503_s4] ss:$0 sm:$0xff]  ;;  %s241_s4 = sshll.u32 %s506_s7, 4  ;;  %s242_s4 = int_to_ptr.hbm [resolvable:$true] %s241_s4 }
  0x24   :  { %131 = vmatpush.msra.mxu0 %v96_v14  ;;  %213 = vmatpush.msra.mxu2 %v202_v34  ;;  %v284_v61 = vld [vmem:[%s505_s6] ss:$0 sm:$0xff] }
  0x25   :  { %173 = vmatpush.msra.mxu1 %v152_v19  ;;  %267 = vmatpush.msra.mxu3 %v152_v19 }
  0x26   :  { %132 = vmatpush.msra.mxu0 %v95_v16  ;;  %214 = vmatpush.msra.mxu2 %v201_v35 }
  0x27   :  { %174 = vmatpush.msra.mxu1 %v151_v21  ;;  %268 = vmatpush.msra.mxu3 %v151_v21 }
  0x28   :  { %133 = vmatpush.msra.mxu0 %v94_v18  ;;  %215 = vmatpush.msra.mxu2 %v200_v36 }
  0x29   :  { %175 = vmatpush.msra.mxu1 %v150_v24  ;;  %269 = vmatpush.msra.mxu3 %v150_v24 }
  0x2a   :  { %134 = vmatpush.msra.mxu0 %v93_v20  ;;  %216 = vmatpush.msra.mxu2 %v199_v37 }
  0x2b   :  { %176 = vmatpush.msra.mxu1 %v149_v25  ;;  %270 = vmatpush.msra.mxu3 %v149_v25 }
  0x2c   :  { %135 = vmatpush.msra.mxu0 %v92_v22  ;;  %217 = vmatpush.msra.mxu2 %v198_v38 }
  0x2d   :  { %257 = vmatmul.msk.f32.vlgmr.msra.gmra.mxu0 %vm109_vm1, %v90_v23  ;;  %177 = vmatpush.msra.mxu1 %v148_v26 }
  0x2e   :  { %271 = vmatpush.msra.mxu3 %v148_v26  ;;  %218 = vmatpush.msra.mxu2 %v197_v39 }
  0x2f   :  { %178 = vmatpush.msra.mxu1 %v147_v28 }
  0x30   :  { %272 = vmatpush.msra.mxu3 %v147_v28  ;;  %219 = vmatpush.msra.mxu2 %v196_v41 }
  0x31   :  { %179 = vmatpush.msra.mxu1 %v146_v29 }
  0x32   :  { %273 = vmatpush.msra.mxu3 %v146_v29  ;;  %220 = vmatpush.msra.mxu2 %v195_v42 }
  0x33   :  { %180 = vmatpush.msra.mxu1 %v145_v30 }
  0x34   :  { %274 = vmatpush.msra.mxu3 %v145_v30  ;;  %221 = vmatpush.msra.mxu2 %v194_v45 }
  0x35   :  { %258 = vmatmul.msk.f32.gmra.mxu0 %vm109_vm1, %v91_v27 }
  0x36   :  { %222 = vmatpush.msra.mxu2 %v193_v47 }
  0x38   :  { %223 = vmatpush.msra.mxu2 %v192_v51 }
  0x3a   :  { %224 = vmatpush.msra.mxu2 %v191_v52 }
  0x3c   :  { %225 = vmatpush.msra.mxu2 %v190_v53 }
  0xaa   :  { %v137_v43 = vpop.f32.mrf.mxu0 }
  0xab   :  { %v138_v44 = vadd.f32 %v282_v40, %v137_v43 }
  0xad   :  { %v143_v46 = vmax.f32 %v138_v44, 0.0 }
  0xaf   :  { %181 = vmatmul.f32.vlgmr.msra.gmra.mxu1 %v143_v46 }
  0xb2   :  { %v140_v48 = vpop.f32.mrf.mxu0 }
  0xb3   :  { %v141_v49 = vadd.f32 %v282_v40, %v140_v48 }
  0xb5   :  { %v144_v50 = vmax.f32 %v141_v49, 0.0 }
  0xb7   :  { %184 = vmatmul.f32.vlgmr.msra.gmra.mxu3 %v144_v50 }
 0x12c   :  { %v182_v55 = vpop.f32.mrf.mxu1 }
 0x12d   :  { %v183_v56 = vadd.f32 %v283_v54, %v182_v55 }
 0x12f   :  { %v188_v57 = vmax.f32 %v183_v56, 0.0 }
 0x131   :  { %226 = vmatmul.f32.vlgmr.msra.gmra.mxu2 %v188_v57 }
 0x13a   :  { %v185_v58 = vpop.f32.mrf.mxu3 }
 0x13b   :  { %v186_v59 = vadd.f32 %v283_v54, %v185_v58 }
 0x13d   :  { %v189_v60 = vmax.f32 %v186_v59, 0.0 }
 0x13f   :  { %229 = vmatmul.f32.gmra.mxu2 %v189_v60 }
 0x1b4   :  { %v227_v62 = vpop.f32.mrf.mxu2 }
 0x1b5   :  { %v228_v63 = vadd.f32 %v284_v61, %v227_v62 }
 0x1b7   :  { %233 = vst [vmem:[#allocation10] sm:$0xff] %v228_v63 }
 0x1c2   :  { %v230_v0 = vpop.f32.mrf.mxu2 }
 0x1c3   :  { %v231_v1 = vadd.f32 %v284_v61, %v230_v0 }
 0x1c5   :  { %234 = vst [vmem:[#allocation10 + $0x8] sm:$0xff] %v231_v1 }
 0x1c6   :  { %247 = dma.vmem_to_hbm [thread:$0]  %s240_s25, 256, %s242_s4, [#allocation4], %s414_s9, %s414_s9, %s415_s10  }
 0x1c7   :  { %411 = dma.done.wait [#allocation4], 256  }
 0x1c8   :  { %412 = vsyncadd [#allocation4], 4294967040 }
 0x1c9   :  { %252 = vsyncpa [#allocation3], 1 }
 0x1ca   :  { %253 = vsyncpa [#allocation6], 1 }
 0x1cb   :  { %254 = vsyncpa [#allocation9], 1 }
 0x1cc   :  { %255 = vsyncpa [#allocation4], 1 }

</bundles_post_ra>
